<compile_context>
chip_gen: v7x
topology: tpu7x:2x2x1
jax: 0.10.0
libtpu: 0.0.40
codegen_flags: <defaults>
</compile_context>

<pallas_src>
import functools

import jax
import jax.numpy as jnp
from jax.experimental import pallas as pl
from jax.experimental.pallas import tpu as pltpu

D_IN = 16                       # features per sample
D_OUT = 26                      # classes
D_OUT_PAD = 32                  # padded output width (lane-dense packing)
PACK = 128 // D_IN              # samples packed per 128-lane row -> 8
PACKED_IN = PACK * D_IN         # 128
PACKED_OUT = PACK * D_OUT_PAD   # 256


def _round_up(n, m):
    return ((n + m - 1) // m) * m


def _affine_kernel(x_ref, w_ref, b_ref, o_ref):
    # One MXU pass per tile of packed rows:
    #   [tile, 128] @ [128, 256] + [1, 256] -> [tile, 256]
    o_ref[...] = (
        jnp.dot(x_ref[...], w_ref[...], preferred_element_type=jnp.float32)
        + b_ref[...]
    ).astype(o_ref.dtype)


def pack_params(params):
    """Fold the activation-free Linear chain and repack it lane-dense.

    Call ONCE per parameter set (hoisted out of the per-forward hot path).
    Returns W_blk [128, 256] and b_blk [1, 256]."""
    w_eff, b_eff = params[0]
    for (w, b) in params[1:]:
        w_eff = w_eff @ w          # [16, out_i]
        b_eff = b_eff @ w + b      # [1,  out_i]
    # Pad 26 -> 32 output columns so the packed output row is 2 full vregs.
    w_pad = jnp.pad(w_eff, ((0, 0), (0, D_OUT_PAD - D_OUT)))   # [16, 32]
    b_pad = jnp.pad(b_eff, ((0, 0), (0, D_OUT_PAD - D_OUT)))   # [1, 32]
    # Block-diagonal replication: packed sample j reads input lanes
    # [j*16,(j+1)*16) and writes output lanes [j*32,(j+1)*32).
    w_blk = jnp.kron(jnp.eye(PACK, dtype=w_pad.dtype), w_pad)  # [128, 256]
    b_blk = jnp.tile(b_pad, (1, PACK))                         # [1, 256]
    return w_blk, b_blk


@functools.partial(jax.jit, static_argnames=("tb",))
def net_letter_forward(x, w_blk, b_blk, *, tb=2048):
    """x: [B, 16] f32; w_blk: [128, 256]; b_blk: [1, 256] (from pack_params)."""
    B, d_in = x.shape
    assert d_in == D_IN

    # --- pack 8 samples per 128-lane row (free contiguous reshape) ---------
    rp = pl.cdiv(B, PACK)                                   # packed rows needed
    # Adaptive tile: multiple of 8 (sublane), capped at tb, sized to the batch
    # so padding never adds more than one (small) tile of zero rows.
    tile_r = min(_round_up(tb, 8), _round_up(rp, 8))
    rp_pad = _round_up(rp, tile_r)
    b_pad_rows = rp_pad * PACK
    if b_pad_rows != B:
        x = jnp.pad(x, ((0, b_pad_rows - B), (0, 0)))
    x_packed = x.reshape(rp_pad, PACKED_IN)                 # [rp_pad, 128]

    grid = (rp_pad // tile_r,)

    cost = pl.CostEstimate(
        flops=2 * rp_pad * PACKED_IN * PACKED_OUT,
        transcendentals=0,
        bytes_accessed=4 * (rp_pad * (PACKED_IN + PACKED_OUT)
                            + PACKED_IN * PACKED_OUT + PACKED_OUT),
    )

    out_packed = pl.pallas_call(
        _affine_kernel,
        out_shape=jax.ShapeDtypeStruct((rp_pad, PACKED_OUT), jnp.float32),
        grid=grid,
        in_specs=[
            pl.BlockSpec((tile_r, PACKED_IN), lambda i: (i, 0)),       # x: batch-tiled
            pl.BlockSpec((PACKED_IN, PACKED_OUT), lambda i: (0, 0)),   # W_blk: resident
            pl.BlockSpec((1, PACKED_OUT), lambda i: (0, 0)),           # b_blk: resident
        ],
        out_specs=pl.BlockSpec((tile_r, PACKED_OUT), lambda i: (i, 0)),
        compiler_params=pltpu.CompilerParams(
            dimension_semantics=("parallel",),       # shard batch tiles across TCs (v7x)
            vmem_limit_bytes=32 * 1024 * 1024,       # headroom for 2x double-buffered tiles
        ),
        cost_estimate=cost,
    )(x_packed, w_blk, b_blk)

    # Free contiguous reshape back to per-sample rows, drop pad rows/cols.
    out = out_packed.reshape(b_pad_rows, D_OUT_PAD)
    return out[:B, :D_OUT]


def init_params(key):
    """Deterministic init matching nn.Linear shapes (stored transposed)."""
    dims = [16, 32, 64, 32, 26]
    params = []
    for i in range(4):
        key, kw, kb = jax.random.split(key, 3)
        fan_in, fan_out = dims[i], dims[i + 1]
        bound = 1.0 / jnp.sqrt(fan_in)
        # PyTorch Linear: W_pt is (out, in); we store W = W_pt.T -> (in, out).
        w = jax.random.uniform(kw, (fan_in, fan_out), jnp.float32, -bound, bound)
        b = jax.random.uniform(kb, (1, fan_out), jnp.float32, -bound, bound)
        params.append((w, b))
    return params


def reference_forward(x, params):
    # Faithful 4-matmul chain, identical to the PyTorch forward.
    h = x
    for (w, b) in params:
        h = h @ w + b
    return h


if __name__ == "__main__":
    key = jax.random.PRNGKey(0)
    key, kx = jax.random.split(key)

    # Deliberately awkward small batch: exercises pack-of-8 and tile padding.
    # (The original script standardizes inputs with a StandardScaler; here we
    # feed standard-normal features, equivalent post-scaling.)
    B = 37
    x = jax.random.normal(kx, (B, D_IN), dtype=jnp.float32)

    params = init_params(key)
    w_blk, b_blk = pack_params(params)          # hoisted out of the hot path

    out = net_letter_forward(x, w_blk, b_blk)
    out = jax.block_until_ready(out)

    ref = reference_forward(x, params)
    assert out.shape == (B, D_OUT)
    assert jnp.allclose(out, ref, atol=1e-4, rtol=1e-4)

    print("KERNEL_OK")
</pallas_src>

<mosaic_0001>
module attributes {stable_mosaic.version = 11 : i64} {
  func.func @_affine_kernel(%arg0: i32, %arg1: memref<8x128xf32, #tpu.memory_space<vmem>>, %arg2: memref<128x256xf32, #tpu.memory_space<vmem>>, %arg3: memref<1x256xf32, #tpu.memory_space<vmem>>, %arg4: memref<8x256xf32, #tpu.memory_space<vmem>>) attributes {dimension_semantics = [#tpu.dimension_semantics<parallel>], iteration_bounds = array<i64: 1>, scalar_prefetch = 0 : i64, scratch_operands = 0 : i64, tpu.core_type = #tpu.core_type<tc>, window_params = [{transform_indices = @transform_0, window_bounds = array<i64: 8, 128>}, {pipeline_mode = #tpu.pipeline_mode<synchronous>, transform_indices = @transform_1, window_bounds = array<i64: 128, 256>}, {pipeline_mode = #tpu.pipeline_mode<synchronous>, transform_indices = @transform_2, window_bounds = array<i64: 1, 256>}, {transform_indices = @transform_3, window_bounds = array<i64: 8, 256>}]} {
    %c0 = arith.constant 0 : index
    %c0_0 = arith.constant 0 : index
    %0 = vector.load %arg1[%c0, %c0_0] : memref<8x128xf32, #tpu.memory_space<vmem>>, vector<8x128xf32>
    %c0_1 = arith.constant 0 : index
    %c0_2 = arith.constant 0 : index
    %1 = vector.load %arg2[%c0_1, %c0_2] : memref<128x256xf32, #tpu.memory_space<vmem>>, vector<128x256xf32>
    %cst = arith.constant dense<0.000000e+00> : vector<8x256xf32>
    %2 = tpu.matmul %0, %1, %cst {dimension_numbers = #tpu.dot_dimension_numbers<[1], [0], [0], [1], [0, 0, 1, 1], [], []>} : vector<8x128xf32>, vector<128x256xf32>, vector<8x256xf32> -> vector<8x256xf32>
    %c0_3 = arith.constant 0 : index
    %c0_4 = arith.constant 0 : index
    %3 = vector.load %arg3[%c0_3, %c0_4] : memref<1x256xf32, #tpu.memory_space<vmem>>, vector<1x256xf32>
    %4 = vector.broadcast %3 : vector<1x256xf32> to vector<8x256xf32>
    %5 = arith.addf %2, %4 : vector<8x256xf32>
    %c0_5 = arith.constant 0 : index
    %c0_6 = arith.constant 0 : index
    %6 = vector.load %arg4[%c0_5, %c0_6] : memref<8x256xf32, #tpu.memory_space<vmem>>, vector<8x256xf32>
    tpu.vector_store %arg4[%c0_5, %c0_6], %5 {strides = array<i32>} : memref<8x256xf32, #tpu.memory_space<vmem>>, vector<8x256xf32>,
    return
  }
  func.func @transform_0(%arg0: i32) -> (i32, i32) {
    %c0_i32 = arith.constant 0 : i32
    %c0_i32_0 = arith.constant 0 : i32
    return %arg0, %c0_i32 : i32, i32
  }
  func.func @transform_1(%arg0: i32) -> (i32, i32) {
    %c0_i32 = arith.constant 0 : i32
    %c0_i32_0 = arith.constant 0 : i32
    %c0_i32_1 = arith.constant 0 : i32
    return %c0_i32, %c0_i32_0 : i32, i32
  }
  func.func @transform_2(%arg0: i32) -> (i32, i32) {
    %c0_i32 = arith.constant 0 : i32
    %c0_i32_0 = arith.constant 0 : i32
    %c0_i32_1 = arith.constant 0 : i32
    return %c0_i32, %c0_i32_0 : i32, i32
  }
  func.func @transform_3(%arg0: i32) -> (i32, i32) {
    %c0_i32 = arith.constant 0 : i32
    %c0_i32_0 = arith.constant 0 : i32
    return %arg0, %c0_i32 : i32, i32
  }
}

</mosaic_0001>

<bundles_post_ra>
// kernel: net_letter_forward.1
= control target key start
LH: loop header
LB: loop body
LE: loop exit
PB: predicated region body
PF: predicated region fallthrough
CT: control target
= control target key end

     0   :  { %8 = vsyncpa [#allocation3], 0  ;;  %s211_s12 = smov [#allocation2]   ;;  %s259_s0 = inlined_call_operand.vmem [shape: f32[8,128], index: 0, kind: input, shape index: {}]   ;;  %s260_s1 = inlined_call_operand.hbm [shape: f32[128,256], index: 1, kind: input, shape index: {}]   ;;  %s261_s2 = inlined_call_operand.vmem [shape: f32[1,256], index: 2, kind: input, shape index: {}]   ;;  %s262_s3 = inlined_call_operand.vmem [shape: f32[8,256], index: 3, kind: output, shape index: {}]  }
   0x1   :  { %s16_s13 = sshll.u32 %s211_s12, 4  ;;  %s187_s16 = scalar_lea.hbm %s260_s1, 4096  ;;  %s17_s13 = int_to_ptr.vmem [resolvable:$true] %s16_s13 }
   0x2   :  { %p188_p0 = scmp.ne.s32.totalorder %s260_s1, %s187_s16  ;;  %p191_p1 = scmp.lt.u32.totalorder %s187_s16, %s260_s1 }
   0x4   :  { %p193_p2 = pnand %p191_p1, %p188_p0 }
   0x6   :  { %196 = shalt.err (!%p193_p2)
}
   0x7   :  { %s197_s21 = scalar_lea.vmem %s17_s13, 4096  ;;  %p202_p4 = scmp.lt.s32.totalorder %s17_s13, %s17_s13 }
   0x8   :  { %p198_p3 = scmp.ne.s32.totalorder %s17_s13, %s197_s21  ;;  %p203_p5 = scmp.lt.s32.totalorder %s197_s21, %s197_s21 }
   0xa   :  { %p204_p6 = por %p203_p5, %p202_p4 }
   0xc   :  { %p205_p7 = pnand %p204_p6, %p198_p3 }
   0xe   :  { %208 = shalt.err (!%p205_p7)
}
   0xf   :  { %s212_s22 = smov 256   ;;  %s213_s23 = smov 16  }
  0x10   :  { %22 = dma.hbm_to_vmem [thread:$0]  %s260_s1, 4096, %s17_s13, [#allocation3], %s212_s22, %s212_s22, %s213_s23  }
  0x11   :  { %209 = dma.done.wait [#allocation3], 4096  }
  0x12   :  { %210 = vsyncadd [#allocation3], 4294963200  ;;  %v214_v0 = vmov 0.0   ;;  %v30_v1 = vld [vmem:[#allocation2 + $0x8] sm:$0xff]  ;;  %v32_v2 = vld [vmem:[#allocation2 + $0x18] sm:$0xff]  ;;  %v63_v50 = vlaneseq }
  0x13   :  { %137 = vmatprep.mubr.f32.mxu0 %v214_v0  ;;  %v29_v3 = vld [vmem:[#allocation2] sm:$0xff]  ;;  %v151_v4 = vpack.c.bf16 %v32_v2, %v30_v1  ;;  %v31_v5 = vld [vmem:[#allocation2 + $0x10] sm:$0xff]  ;;  %v34_v6 = vld [vmem:[#allocation2 + $0x28] sm:$0xff] }
  0x14   :  { %v36_v7 = vld [vmem:[#allocation2 + $0x38] sm:$0xff]  ;;  %v153_v8 = vpack.c.bf16 %v31_v5, %v29_v3  ;;  %v33_v10 = vld [vmem:[#allocation2 + $0x20] sm:$0xff]  ;;  %v35_v11 = vld [vmem:[#allocation2 + $0x30] sm:$0xff]  ;;  %v64_v51 = vshrl.u32 %v63_v50, 7 }
  0x15   :  { %v155_v9 = vpack.c.bf16 %v36_v7, %v34_v6  ;;  %v38_v12 = vld [vmem:[#allocation2 + $0x48] sm:$0xff]  ;;  %152 = vmatprep.subr.bf16.mxu0 %v151_v4  ;;  %v40_v13 = vld [vmem:[#allocation2 + $0x58] sm:$0xff]  ;;  %v157_v14 = vpack.c.bf16 %v35_v11, %v33_v10  ;;  %v37_v16 = vld [vmem:[#allocation2 + $0x40] sm:$0xff] }
  0x16   :  { %154 = vmatpush1.bf16.msra.mxu0 %v153_v8  ;;  %v159_v15 = vpack.c.bf16 %v40_v13, %v38_v12  ;;  %v39_v17 = vld [vmem:[#allocation2 + $0x50] sm:$0xff]  ;;  %v42_v18 = vld [vmem:[#allocation2 + $0x68] sm:$0xff]  ;;  %v44_v19 = vld [vmem:[#allocation2 + $0x78] sm:$0xff]  ;;  %v65_v52 = vsub.s32 0, %v64_v51  ;;  %v69_v54 = vsub.s32 1, %v64_v51 }
  0x17   :  { %156 = vmatprep.subr.bf16.mxu0 %v155_v9  ;;  %v161_v20 = vpack.c.bf16 %v39_v17, %v37_v16  ;;  %v163_v21 = vpack.c.bf16 %v44_v19, %v42_v18  ;;  %v41_v22 = vld [vmem:[#allocation2 + $0x60] sm:$0xff]  ;;  %v43_v23 = vld [vmem:[#allocation2 + $0x70] sm:$0xff]  ;;  %v46_v24 = vld [vmem:[#allocation2 + $0x88] sm:$0xff] }
  0x18   :  { %v48_v25 = vld [vmem:[#allocation2 + $0x98] sm:$0xff]  ;;  %v165_v26 = vpack.c.bf16 %v43_v23, %v41_v22  ;;  %v45_v28 = vld [vmem:[#allocation2 + $0x80] sm:$0xff]  ;;  %v47_v29 = vld [vmem:[#allocation2 + $0x90] sm:$0xff] }
  0x19   :  { %v167_v27 = vpack.c.bf16 %v48_v25, %v46_v24  ;;  %v50_v30 = vld [vmem:[#allocation2 + $0xa8] sm:$0xff]  ;;  %v52_v31 = vld [vmem:[#allocation2 + $0xb8] sm:$0xff]  ;;  %v169_v32 = vpack.c.bf16 %v47_v29, %v45_v28  ;;  %v49_v34 = vld [vmem:[#allocation2 + $0xa0] sm:$0xff] }
  0x1a   :  { %158 = vmatpush1.bf16.msra.mxu0 %v157_v14  ;;  %v171_v33 = vpack.c.bf16 %v52_v31, %v50_v30  ;;  %v51_v35 = vld [vmem:[#allocation2 + $0xb0] sm:$0xff]  ;;  %v54_v36 = vld [vmem:[#allocation2 + $0xc8] sm:$0xff]  ;;  %v56_v37 = vld [vmem:[#allocation2 + $0xd8] sm:$0xff] }
  0x1b   :  { %160 = vmatprep.subr.bf16.mxu0 %v159_v15  ;;  %v173_v38 = vpack.c.bf16 %v51_v35, %v49_v34  ;;  %v175_v39 = vpack.c.bf16 %v56_v37, %v54_v36  ;;  %v53_v40 = vld [vmem:[#allocation2 + $0xc0] sm:$0xff]  ;;  %v55_v41 = vld [vmem:[#allocation2 + $0xd0] sm:$0xff]  ;;  %v58_v42 = vld [vmem:[#allocation2 + $0xe8] sm:$0xff] }
  0x1c   :  { %v60_v43 = vld [vmem:[#allocation2 + $0xf8] sm:$0xff]  ;;  %v177_v44 = vpack.c.bf16 %v55_v41, %v53_v40  ;;  %v57_v46 = vld [vmem:[#allocation2 + $0xe0] sm:$0xff]  ;;  %v59_v47 = vld [vmem:[#allocation2 + $0xf0] sm:$0xff] }
  0x1d   :  { %v179_v45 = vpack.c.bf16 %v60_v43, %v58_v42  ;;  %v181_v48 = vpack.c.bf16 %v59_v47, %v57_v46  ;;  %v28_v49 = vld [vmem:[%s259_s0] sm:$0xff] }
  0x1e   :  { %162 = vmatpush1.bf16.msra.mxu0 %v161_v20  ;;  %v61_v53 = vld [vmem:[%s261_s2] sm:$0x3] }
  0x1f   :  { %164 = vmatprep.subr.bf16.mxu0 %v163_v21  ;;  %v66_v55 = vrot.slane %v61_v53, %v65_v52  ;;  %v70_v56 = vrot.slane %v61_v53, %v69_v54 }
  0x22   :  { %166 = vmatpush1.bf16.msra.mxu0 %v165_v26 }
  0x23   :  { %168 = vmatprep.subr.bf16.mxu0 %v167_v27 }
  0x26   :  { %170 = vmatpush1.bf16.msra.mxu0 %v169_v32 }
  0x27   :  { %172 = vmatprep.subr.bf16.mxu0 %v171_v33 }
  0x2a   :  { %174 = vmatpush1.bf16.msra.mxu0 %v173_v38 }
  0x2b   :  { %176 = vmatprep.subr.bf16.mxu0 %v175_v39 }
  0x2e   :  { %178 = vmatpush1.bf16.msra.mxu0 %v177_v44 }
  0x2f   :  { %180 = vmatprep.subr.bf16.mxu0 %v179_v45 }
  0x32   :  { %182 = vmatpush1.bf16.msra.mxu0 %v181_v48 }
  0x35   :  { %138 = vmatmul.mubr.f32.vlgmr.msra.gmra.mrb[0].mxu0 %v28_v49 }
 0x108   :  { %v139_v57 = vpop.f32.mrb[0].mxu0 }
 0x109   :  { %v140_v58 = vadd.f32 %v139_v57, %v66_v55  ;;  %v141_v59 = vpop.f32.mrb[1].mxu0 }
 0x10a   :  { %v142_v60 = vadd.f32 %v141_v59, %v70_v56 }
 0x10b   :  { %144 = vst [vmem:[%s262_s3] sm:$0xff] %v140_v58 }
 0x10c   :  { %145 = vst [vmem:[%s262_s3 + $0x8] sm:$0xff] %v142_v60 }
 0x10d   :  { %150 = vsyncpa [#allocation3], 1 }

</bundles_post_ra>
